<compile_context>
chip_gen: v7x
topology: tpu7x:2x2x1
jax: 0.10.0
libtpu: 0.0.40
codegen_flags: <defaults>
</compile_context>

<pallas_src>
import jax
import jax.numpy as jnp
from jax import lax
from jax.experimental import pallas as pl
from jax.experimental.pallas import tpu as pltpu


def downsample_forward(x_nchw, weight_oihw, bias):
    """y = Conv2d(x, weight, bias, kernel=3, stride=2, padding=1); NCHW in / NCHW out."""
    N, Cin, H, W = x_nchw.shape
    Cout = weight_oihw.shape[0]
    Hout = (H + 2 - 3) // 2 + 1
    Wout = (W + 2 - 3) // 2 + 1
    Hq, Wq = Hout + 1, Wout + 1          # phase-tensor spatial extents
    M = Hout * Wout
    L = N * M                            # flattened (n, i, j) -> output lane axis (=128 here)
    K = 9 * Cin                          # fused im2col contraction dim

    # ---- single fused XLA pass: NCHW -> padded NHWC -> even/odd phase stack ----------
    # phases[(rh*2+rw)*N + n, a, b, c] == x_padded[n, 2a+rh, 2b+rw, c]   (zero padded)
    x = jnp.transpose(x_nchw, (0, 2, 3, 1))                                  # NHWC
    x_pad = jnp.pad(x, ((0, 0), (1, 2 * Hq - H - 1), (1, 2 * Wq - W - 1), (0, 0)))
    xr = x_pad.reshape(N, Hq, 2, Wq, 2, Cin)
    phases = jnp.transpose(xr, (2, 4, 0, 1, 3, 5)).reshape(4 * N, Hq, Wq, Cin)

    # PyTorch (Cout, Cin, kh, kw) -> (Cout, kh, kw, Cin) -> (Cout, 9*Cin)
    w2 = jnp.transpose(weight_oihw, (0, 2, 3, 1)).reshape(Cout, K)
    b_col = bias.reshape(Cout, 1).astype(jnp.float32)

    trans_b = (((1,), (1,)), ((), ()))   # contract K of both operands -> (Cout, L)

    def kernel(ph_ref, w_ref, b_ref, o_ref, a_ref):
        # Build im2col tile A (N, Hout, Wout, 9*Cin) in VMEM scratch; each tap is a
        # static ref-window load (only the needed slab), stored at its lane offset.
        for kh in range(3):
            dh, rh = kh // 2, kh % 2
            for kw in range(3):
                dw, rw = kw // 2, kw % 2
                t = kh * 3 + kw
                p0 = (rh * 2 + rw) * N
                win = ph_ref[p0:p0 + N, dh:dh + Hout, dw:dw + Wout, :]
                a_ref[:, :, :, t * Cin:(t + 1) * Cin] = win.astype(jnp.float32)

        # (N, Hout, Wout, 9*Cin) -> (L, 9*Cin) is layout-free (Wout is the sublane group).
        a = a_ref[...].reshape(L, K)
        # One MXU dot with K = 9*Cin, f32 accumulate; bias added once in the epilogue.
        # NOTE: at real pyramid widths (Cin/Cout >= 128) cast w/a to bf16 here
        # (keep preferred_element_type=f32) for single-pass MXU throughput.
        acc = lax.dot_general(w_ref[...], a, dimension_numbers=trans_b,
                              preferred_element_type=jnp.float32)
        o_ref[...] = (acc + b_ref[...]).astype(o_ref.dtype)                  # (Cout, L)

    cost = pl.CostEstimate(
        flops=2 * L * K * Cout,
        transcendentals=0,
        bytes_accessed=(phases.size + w2.size + b_col.size + Cout * L) * 4,
    )

    out2d = pl.pallas_call(
        kernel,
        out_shape=jax.ShapeDtypeStruct((Cout, L), x_nchw.dtype),
        grid=(1,),                                           # whole (small) batch in one step
        in_specs=[
            pl.BlockSpec((4 * N, Hq, Wq, Cin), lambda i: (0, 0, 0, 0)),   # stacked phases
            pl.BlockSpec((Cout, K), lambda i: (0, 0)),                    # resident weights
            pl.BlockSpec((Cout, 1), lambda i: (0, 0)),                    # resident bias
        ],
        out_specs=pl.BlockSpec((Cout, L), lambda i: (0, 0)),              # lane-dense (8,128)
        scratch_shapes=[pltpu.VMEM((N, Hout, Wout, K), jnp.float32)],
        compiler_params=pltpu.CompilerParams(
            dimension_semantics=("arbitrary",),
            vmem_limit_bytes=32 * 1024 * 1024,
        ),
        cost_estimate=cost,
    )(phases, w2, b_col)

    # (Cout, N*M) columns are ordered (n, i, j): trailing-dim split is free, the tiny
    # (Cout, N) leading-dim swap gives NCHW.
    return out2d.reshape(Cout, N, Hout, Wout).transpose(1, 0, 2, 3)


if __name__ == "__main__":
    # Module config: in_embed_dim=4, out_embed_dim=8, patch_size=2.
    N, Cin, H, W = 2, 4, 16, 16
    Cout = 8

    key = jax.random.PRNGKey(0)
    kx, kw, kb = jax.random.split(key, 3)

    # Deterministic PyTorch-conv-style uniform init.
    fan_in = Cin * 3 * 3
    bound = 1.0 / (fan_in ** 0.5)
    weight = jax.random.uniform(kw, (Cout, Cin, 3, 3), jnp.float32, -bound, bound)
    bias = jax.random.uniform(kb, (Cout,), jnp.float32, -bound, bound)
    x = jax.random.normal(kx, (N, Cin, H, W), jnp.float32)

    # task / register_hook / get_feat args of forward() are unused (no compute).
    y = downsample_forward(x, weight, bias)
    y = jax.block_until_ready(y)

    # Sanity check against XLA's conv.
    ref = lax.conv_general_dilated(
        x, weight, window_strides=(2, 2), padding=((1, 1), (1, 1)),
        dimension_numbers=("NCHW", "OIHW", "NCHW"),
    ) + bias.reshape(1, Cout, 1, 1)

    assert y.shape == (N, Cout, H // 2, W // 2), y.shape
    assert jnp.allclose(y, ref, atol=1e-4, rtol=1e-4), float(jnp.max(jnp.abs(y - ref)))

    print("KERNEL_OK")
</pallas_src>

<mosaic_0001>
module attributes {stable_mosaic.version = 11 : i64} {
  func.func @kernel(%arg0: i32, %arg1: memref<8x9x9x4xf32, #tpu.memory_space<vmem>>, %arg2: memref<8x36xf32, #tpu.memory_space<vmem>>, %arg3: memref<8x1xf32, #tpu.memory_space<vmem>>, %arg4: memref<8x128xf32, #tpu.memory_space<vmem>>, %arg5: memref<2x8x8x36xf32, #tpu.memory_space<vmem>>) attributes {dimension_semantics = [#tpu.dimension_semantics<arbitrary>], iteration_bounds = array<i64: 1>, scalar_prefetch = 0 : i64, scratch_operands = 1 : i64, tpu.core_type = #tpu.core_type<tc>, window_params = [{pipeline_mode = #tpu.pipeline_mode<synchronous>, transform_indices = @transform_0, window_bounds = array<i64: 8, 9, 9, 4>}, {pipeline_mode = #tpu.pipeline_mode<synchronous>, transform_indices = @transform_1, window_bounds = array<i64: 8, 36>}, {pipeline_mode = #tpu.pipeline_mode<synchronous>, transform_indices = @transform_2, window_bounds = array<i64: 8, 1>}, {pipeline_mode = #tpu.pipeline_mode<synchronous>, transform_indices = @transform_3, window_bounds = array<i64: 8, 128>}]} {
    %c0 = arith.constant 0 : index
    %c0_0 = arith.constant 0 : index
    %c0_1 = arith.constant 0 : index
    %c0_2 = arith.constant 0 : index
    %0 = vector.load %arg1[%c0, %c0_0, %c0_1, %c0_2] : memref<8x9x9x4xf32, #tpu.memory_space<vmem>>, vector<2x8x8x4xf32>
    %c0_3 = arith.constant 0 : index
    %c0_4 = arith.constant 0 : index
    %c0_5 = arith.constant 0 : index
    %c0_6 = arith.constant 0 : index
    %1 = vector.load %arg5[%c0_3, %c0_4, %c0_5, %c0_6] : memref<2x8x8x36xf32, #tpu.memory_space<vmem>>, vector<2x8x8x4xf32>
    tpu.vector_store %arg5[%c0_3, %c0_4, %c0_5, %c0_6], %0 {strides = array<i32>} : memref<2x8x8x36xf32, #tpu.memory_space<vmem>>, vector<2x8x8x4xf32>,
    %c2 = arith.constant 2 : index
    %c0_7 = arith.constant 0 : index
    %c0_8 = arith.constant 0 : index
    %c0_9 = arith.constant 0 : index
    %2 = vector.load %arg1[%c2, %c0_7, %c0_8, %c0_9] : memref<8x9x9x4xf32, #tpu.memory_space<vmem>>, vector<2x8x8x4xf32>
    %c0_10 = arith.constant 0 : index
    %c0_11 = arith.constant 0 : index
    %c0_12 = arith.constant 0 : index
    %c4 = arith.constant 4 : index
    %3 = vector.load %arg5[%c0_10, %c0_11, %c0_12, %c4] : memref<2x8x8x36xf32, #tpu.memory_space<vmem>>, vector<2x8x8x4xf32>
    tpu.vector_store %arg5[%c0_10, %c0_11, %c0_12, %c4], %2 {strides = array<i32>} : memref<2x8x8x36xf32, #tpu.memory_space<vmem>>, vector<2x8x8x4xf32>,
    %c0_13 = arith.constant 0 : index
    %c0_14 = arith.constant 0 : index
    %c1 = arith.constant 1 : index
    %c0_15 = arith.constant 0 : index
    %4 = vector.load %arg1[%c0_13, %c0_14, %c1, %c0_15] : memref<8x9x9x4xf32, #tpu.memory_space<vmem>>, vector<2x8x8x4xf32>
    %c0_16 = arith.constant 0 : index
    %c0_17 = arith.constant 0 : index
    %c0_18 = arith.constant 0 : index
    %c8 = arith.constant 8 : index
    %5 = vector.load %arg5[%c0_16, %c0_17, %c0_18, %c8] : memref<2x8x8x36xf32, #tpu.memory_space<vmem>>, vector<2x8x8x4xf32>
    tpu.vector_store %arg5[%c0_16, %c0_17, %c0_18, %c8], %4 {strides = array<i32>} : memref<2x8x8x36xf32, #tpu.memory_space<vmem>>, vector<2x8x8x4xf32>,
    %c4_19 = arith.constant 4 : index
    %c0_20 = arith.constant 0 : index
    %c0_21 = arith.constant 0 : index
    %c0_22 = arith.constant 0 : index
    %6 = vector.load %arg1[%c4_19, %c0_20, %c0_21, %c0_22] : memref<8x9x9x4xf32, #tpu.memory_space<vmem>>, vector<2x8x8x4xf32>
    %c0_23 = arith.constant 0 : index
    %c0_24 = arith.constant 0 : index
    %c0_25 = arith.constant 0 : index
    %c12 = arith.constant 12 : index
    %7 = vector.load %arg5[%c0_23, %c0_24, %c0_25, %c12] : memref<2x8x8x36xf32, #tpu.memory_space<vmem>>, vector<2x8x8x4xf32>
    tpu.vector_store %arg5[%c0_23, %c0_24, %c0_25, %c12], %6 {strides = array<i32>} : memref<2x8x8x36xf32, #tpu.memory_space<vmem>>, vector<2x8x8x4xf32>,
    %c6 = arith.constant 6 : index
    %c0_26 = arith.constant 0 : index
    %c0_27 = arith.constant 0 : index
    %c0_28 = arith.constant 0 : index
    %8 = vector.load %arg1[%c6, %c0_26, %c0_27, %c0_28] : memref<8x9x9x4xf32, #tpu.memory_space<vmem>>, vector<2x8x8x4xf32>
    %c0_29 = arith.constant 0 : index
    %c0_30 = arith.constant 0 : index
    %c0_31 = arith.constant 0 : index
    %c16 = arith.constant 16 : index
    %9 = vector.load %arg5[%c0_29, %c0_30, %c0_31, %c16] : memref<2x8x8x36xf32, #tpu.memory_space<vmem>>, vector<2x8x8x4xf32>
    tpu.vector_store %arg5[%c0_29, %c0_30, %c0_31, %c16], %8 {strides = array<i32>} : memref<2x8x8x36xf32, #tpu.memory_space<vmem>>, vector<2x8x8x4xf32>,
    %c4_32 = arith.constant 4 : index
    %c0_33 = arith.constant 0 : index
    %c1_34 = arith.constant 1 : index
    %c0_35 = arith.constant 0 : index
    %10 = vector.load %arg1[%c4_32, %c0_33, %c1_34, %c0_35] : memref<8x9x9x4xf32, #tpu.memory_space<vmem>>, vector<2x8x8x4xf32>
    %c0_36 = arith.constant 0 : index
    %c0_37 = arith.constant 0 : index
    %c0_38 = arith.constant 0 : index
    %c20 = arith.constant 20 : index
    %11 = vector.load %arg5[%c0_36, %c0_37, %c0_38, %c20] : memref<2x8x8x36xf32, #tpu.memory_space<vmem>>, vector<2x8x8x4xf32>
    tpu.vector_store %arg5[%c0_36, %c0_37, %c0_38, %c20], %10 {strides = array<i32>} : memref<2x8x8x36xf32, #tpu.memory_space<vmem>>, vector<2x8x8x4xf32>,
    %c0_39 = arith.constant 0 : index
    %c1_40 = arith.constant 1 : index
    %c0_41 = arith.constant 0 : index
    %c0_42 = arith.constant 0 : index
    %12 = vector.load %arg1[%c0_39, %c1_40, %c0_41, %c0_42] : memref<8x9x9x4xf32, #tpu.memory_space<vmem>>, vector<2x8x8x4xf32>
    %c0_43 = arith.constant 0 : index
    %c0_44 = arith.constant 0 : index
    %c0_45 = arith.constant 0 : index
    %c24 = arith.constant 24 : index
    %13 = vector.load %arg5[%c0_43, %c0_44, %c0_45, %c24] : memref<2x8x8x36xf32, #tpu.memory_space<vmem>>, vector<2x8x8x4xf32>
    tpu.vector_store %arg5[%c0_43, %c0_44, %c0_45, %c24], %12 {strides = array<i32>} : memref<2x8x8x36xf32, #tpu.memory_space<vmem>>, vector<2x8x8x4xf32>,
    %c2_46 = arith.constant 2 : index
    %c1_47 = arith.constant 1 : index
    %c0_48 = arith.constant 0 : index
    %c0_49 = arith.constant 0 : index
    %14 = vector.load %arg1[%c2_46, %c1_47, %c0_48, %c0_49] : memref<8x9x9x4xf32, #tpu.memory_space<vmem>>, vector<2x8x8x4xf32>
    %c0_50 = arith.constant 0 : index
    %c0_51 = arith.constant 0 : index
    %c0_52 = arith.constant 0 : index
    %c28 = arith.constant 28 : index
    %15 = vector.load %arg5[%c0_50, %c0_51, %c0_52, %c28] : memref<2x8x8x36xf32, #tpu.memory_space<vmem>>, vector<2x8x8x4xf32>
    tpu.vector_store %arg5[%c0_50, %c0_51, %c0_52, %c28], %14 {strides = array<i32>} : memref<2x8x8x36xf32, #tpu.memory_space<vmem>>, vector<2x8x8x4xf32>,
    %c0_53 = arith.constant 0 : index
    %c1_54 = arith.constant 1 : index
    %c1_55 = arith.constant 1 : index
    %c0_56 = arith.constant 0 : index
    %16 = vector.load %arg1[%c0_53, %c1_54, %c1_55, %c0_56] : memref<8x9x9x4xf32, #tpu.memory_space<vmem>>, vector<2x8x8x4xf32>
    %c0_57 = arith.constant 0 : index
    %c0_58 = arith.constant 0 : index
    %c0_59 = arith.constant 0 : index
    %c32 = arith.constant 32 : index
    %17 = vector.load %arg5[%c0_57, %c0_58, %c0_59, %c32] : memref<2x8x8x36xf32, #tpu.memory_space<vmem>>, vector<2x8x8x4xf32>
    tpu.vector_store %arg5[%c0_57, %c0_58, %c0_59, %c32], %16 {strides = array<i32>} : memref<2x8x8x36xf32, #tpu.memory_space<vmem>>, vector<2x8x8x4xf32>,
    %c0_60 = arith.constant 0 : index
    %c0_61 = arith.constant 0 : index
    %c0_62 = arith.constant 0 : index
    %c0_63 = arith.constant 0 : index
    %18 = vector.load %arg5[%c0_60, %c0_61, %c0_62, %c0_63] : memref<2x8x8x36xf32, #tpu.memory_space<vmem>>, vector<2x8x8x36xf32>
    %19 = vector.shape_cast %18 : vector<2x8x8x36xf32> to vector<128x36xf32>
    %c0_64 = arith.constant 0 : index
    %c0_65 = arith.constant 0 : index
    %20 = vector.load %arg2[%c0_64, %c0_65] : memref<8x36xf32, #tpu.memory_space<vmem>>, vector<8x36xf32>
    %cst = arith.constant dense<0.000000e+00> : vector<8x128xf32>
    %21 = tpu.matmul %20, %19, %cst {dimension_numbers = #tpu.dot_dimension_numbers<[1], [1], [0], [0], [0, 0, 1, 0], [], []>} : vector<8x36xf32>, vector<128x36xf32>, vector<8x128xf32> -> vector<8x128xf32>
    %c0_66 = arith.constant 0 : index
    %c0_67 = arith.constant 0 : index
    %22 = vector.load %arg3[%c0_66, %c0_67] : memref<8x1xf32, #tpu.memory_space<vmem>>, vector<8x1xf32>
    %23 = vector.broadcast %22 : vector<8x1xf32> to vector<8x128xf32>
    %24 = arith.addf %21, %23 : vector<8x128xf32>
    %c0_68 = arith.constant 0 : index
    %c0_69 = arith.constant 0 : index
    %25 = vector.load %arg4[%c0_68, %c0_69] : memref<8x128xf32, #tpu.memory_space<vmem>>, vector<8x128xf32>
    tpu.vector_store %arg4[%c0_68, %c0_69], %24 {strides = array<i32>} : memref<8x128xf32, #tpu.memory_space<vmem>>, vector<8x128xf32>,
    return
  }
  func.func @transform_0(%arg0: i32) -> (i32, i32, i32, i32) {
    %c0_i32 = arith.constant 0 : i32
    %c0_i32_0 = arith.constant 0 : i32
    %c0_i32_1 = arith.constant 0 : i32
    %c0_i32_2 = arith.constant 0 : i32
    %c0_i32_3 = arith.constant 0 : i32
    return %c0_i32, %c0_i32_0, %c0_i32_1, %c0_i32_2 : i32, i32, i32, i32
  }
  func.func @transform_1(%arg0: i32) -> (i32, i32) {
    %c0_i32 = arith.constant 0 : i32
    %c0_i32_0 = arith.constant 0 : i32
    %c0_i32_1 = arith.constant 0 : i32
    return %c0_i32, %c0_i32_0 : i32, i32
  }
  func.func @transform_2(%arg0: i32) -> (i32, i32) {
    %c0_i32 = arith.constant 0 : i32
    %c0_i32_0 = arith.constant 0 : i32
    %c0_i32_1 = arith.constant 0 : i32
    return %c0_i32, %c0_i32_0 : i32, i32
  }
  func.func @transform_3(%arg0: i32) -> (i32, i32) {
    %c0_i32 = arith.constant 0 : i32
    %c0_i32_0 = arith.constant 0 : i32
    %c0_i32_1 = arith.constant 0 : i32
    return %c0_i32, %c0_i32_0 : i32, i32
  }
}

</mosaic_0001>

<bundles_post_ra>
// kernel: tpu_custom_call.1
= control target key start
LH: loop header
LB: loop body
LE: loop exit
PB: predicated region body
PF: predicated region fallthrough
CT: control target
= control target key end

     0   :  { %s1240_s16 = smov 8   ;;  %s1241_s17 = smov 4   ;;  %vm31_vm0 = vcmask 31744   ;;  %s1940_s0 = inlined_call_operand.vmem [shape: f32[8,9,9,4], index: 0, kind: input, shape index: {}]   ;;  %s1941_s1 = inlined_call_operand.vmem [shape: f32[8,36], index: 1, kind: input, shape index: {}]   ;;  %s1942_s2 = inlined_call_operand.vmem [shape: f32[8,1], index: 2, kind: input, shape index: {}]   ;;  %s1943_s3 = inlined_call_operand.hbm [shape: f32[8,128], index: 3, kind: output, shape index: {}]  }
   0x1   :  { %v146_v0 = vld [vmem:[%s1940_s0 + $0x1] sm:$0xff]  ;;  %v147_v2 = vld [vmem:[%s1940_s0 + $0x11] sm:$0xff]  ;;  %s1242_s7 = smov 12   ;;  %s1243_s18 = smov 16  }
   0x2   :  { %v989_v1 = vld [vmem:[%s1940_s0 + $0x120] sm:$0xff]  ;;  %178 = vrot.lane.b32.xlu1 %v146_v0, %s1240_s16  ;;  %v990_v3 = vld [vmem:[%s1940_s0 + $0x130] sm:$0xff]  ;;  %s1244_s25 = smov 20   ;;  %s1245_s28 = smov 24  }
   0x3   :  { %81 = vrot.lane.b32.xlu0 %v989_v1, %s1241_s17  ;;  %v1054_v4 = vld [vmem:[%s1940_s0 + $0x20] sm:$0xff]  ;;  %v1053_v5 = vld [vmem:[%s1940_s0 + $0x10] sm:$0xff] }
   0x4   :  { %34 = vst.msk [vmem:[#allocation2 + $0x10] sm:$0xff] %vm31_vm0, %v1054_v4  ;;  %33 = vst.msk [vmem:[#allocation2 + $0x8] sm:$0xff] %vm31_vm0, %v1053_v5  ;;  %v1006_v6 = vld [vmem:[%s1940_s0 + $0x250] sm:$0xff]  ;;  %v1005_v7 = vld [vmem:[%s1940_s0 + $0x240] sm:$0xff] }
   0x5   :  { %v1056_v8 = vld [vmem:[%s1940_s0 + $0x40] sm:$0xff]  ;;  %v1055_v9 = vld [vmem:[%s1940_s0 + $0x30] sm:$0xff] }
   0x6   :  { %180 = vrot.lane.b32.xlu1 %v147_v2, %s1240_s16  ;;  %35 = vst.msk [vmem:[#allocation2 + $0x18] sm:$0xff] %vm31_vm0, %v1055_v9  ;;  %36 = vst.msk [vmem:[#allocation2 + $0x20] sm:$0xff] %vm31_vm0, %v1056_v8  ;;  %v1022_v10 = vld [vmem:[%s1940_s0 + $0x370] sm:$0xff]  ;;  %v1021_v11 = vld [vmem:[%s1940_s0 + $0x360] sm:$0xff] }
   0x7   :  { %83 = vrot.lane.b32.xlu0 %v990_v3, %s1241_s17  ;;  %v1322_v12 = vld [vmem:[%s1940_s0 + $0x60] sm:$0xff]  ;;  %v1327_v13 = vld [vmem:[%s1940_s0 + $0x50] sm:$0xff] }
   0x8   :  { %37 = vst.msk [vmem:[#allocation2 + $0x28] sm:$0xff] %vm31_vm0, %v1327_v13  ;;  %38 = vst.msk [vmem:[#allocation2 + $0x30] sm:$0xff] %vm31_vm0, %v1322_v12  ;;  %v1038_v14 = vld [vmem:[%s1940_s0 + $0x251] sm:$0xff]  ;;  %v1037_v15 = vld [vmem:[%s1940_s0 + $0x241] sm:$0xff] }
   0x9   :  { %v15_v16 = vld [vmem:[%s1940_s0] sm:$0xff]  ;;  %v1350_v17 = vld [vmem:[%s1940_s0 + $0x70] sm:$0xff] }
   0xa   :  { %278 = vrot.lane.b32.xlu1 %v1006_v6, %s1242_s7  ;;  %32 = vst.msk [vmem:[#allocation2] sm:$0xff] %vm31_vm0, %v15_v16  ;;  %39 = vst.msk [vmem:[#allocation2 + $0x38] sm:$0xff] %vm31_vm0, %v1350_v17  ;;  %v1070_v18 = vld [vmem:[%s1940_s0 + $0x140] sm:$0xff]  ;;  %v1362_v19 = vld [vmem:[%s1940_s0 + $0xb0] sm:$0xff] }
   0xb   :  { %276 = vrot.lane.b32.xlu0 %v1005_v7, %s1242_s7  ;;  %v1367_v20 = vld [vmem:[%s1940_s0 + $0xa0] sm:$0xff]  ;;  %42 = vst.msk [vmem:[#allocation2 + $0x50] sm:$0xff] %vm31_vm0, %v1362_v19 }
   0xc   :  { %41 = vst.msk [vmem:[#allocation2 + $0x48] sm:$0xff] %vm31_vm0, %v1367_v20 }
   0xe   :  { %376 = vrot.lane.b32.xlu1 %v1022_v10, %s1243_s18 }
   0xf   :  { %374 = vrot.lane.b32.xlu0 %v1021_v11, %s1243_s18 }
  0x12   :  { %473 = vrot.lane.b32.xlu1 %v1038_v14, %s1244_s25 }
  0x13   :  { %471 = vrot.lane.b32.xlu0 %v1037_v15, %s1244_s25 }
  0x16   :  { %571 = vrot.lane.b32.xlu1 %v1054_v4, %s1245_s28 }
  0x17   :  { %569 = vrot.lane.b32.xlu0 %v1053_v5, %s1245_s28 }
  0x18   :  { %8 = vsyncpa [#allocation4], 0  ;;  %s1246_s9 = smov 28   ;;  %v1086_v21 = vld [vmem:[%s1940_s0 + $0x21] sm:$0xff]  ;;  %v1247_v22 = vmov 0.0|0.0   ;;  %s1248_s12 = smov 32  }
  0x19   :  { %1170 = vmatprep.subr.bf16.mxu0 %v1247_v22  ;;  %v992_v23 = vld [vmem:[%s1940_s0 + $0x150] sm:$0xff]  ;;  %v1007_v26 = vld [vmem:[%s1940_s0 + $0x260] sm:$0xff]  ;;  %vm129_vm1 = vcmask 64544   ;;  %vm226_vm2 = vcmask 97344   ;;  %vm324_vm3 = vcmask 130144   ;;  %vm422_vm4 = vcmask 162944  }
  0x1a   :  { %669 = vrot.lane.b32.xlu1 %v1070_v18, %s1246_s9  ;;  %v149_v24 = vld [vmem:[%s1940_s0 + $0x31] sm:$0xff]  ;;  %v1023_v28 = vld [vmem:[%s1940_s0 + $0x380] sm:$0xff]  ;;  %vm519_vm5 = vcmask 195744   ;;  %vm617_vm6 = vcmask 228544   ;;  %vm715_vm7 = vcmask 261344   ;;  %vm812_vm8 = vcmask 294144  }
  0x1b   :  { %667 = vrot.lane.b32.xlu0 %v990_v3, %s1246_s9  ;;  %v1008_v25 = vld [vmem:[%s1940_s0 + $0x270] sm:$0xff]  ;;  %v1039_v30 = vld [vmem:[%s1940_s0 + $0x261] sm:$0xff]  ;;  %vm852_vm9 = vcmask 293888   ;;  %vm1249_vm11 = vmmov 0   ;;  %s1252_s15 = smov [#allocation3]  }
  0x1c   :  { %v1024_v27 = vld [vmem:[%s1940_s0 + $0x390] sm:$0xff]  ;;  %v1423_v32 = vld [vmem:[%s1940_s0 + $0xc0] sm:$0xff]  ;;  %vm1631_vm10 = vmpackc.low %vm852_vm9, %vm852_vm9  ;;  %s981_s19 = sshll.u32 %s1252_s15, 4  ;;  %s982_s19 = int_to_ptr.vmem [resolvable:$true] %s981_s19 }
  0x1d   :  { %v1040_v29 = vld [vmem:[%s1940_s0 + $0x271] sm:$0xff]  ;;  %43 = vst.msk [vmem:[#allocation2 + $0x58] sm:$0xff] %vm31_vm0, %v1423_v32  ;;  %v1072_v33 = vld [vmem:[%s1940_s0 + $0x160] sm:$0xff]  ;;  %s1216_s20 = scalar_lea.vmem %s982_s19, 128  ;;  %p1221_p1 = scmp.lt.s32.totalorder %s982_s19, %s982_s19 }
  0x1e   :  { %766 = vrot.lane.b32.xlu1 %v1086_v21, %s1248_s12  ;;  %v1418_v31 = vld [vmem:[%s1940_s0 + $0xd0] sm:$0xff]  ;;  %v1088_v34 = vld [vmem:[%s1940_s0 + $0x41] sm:$0xff]  ;;  %p1217_p0 = scmp.ne.s32.totalorder %s982_s19, %s1216_s20  ;;  %p1222_p2 = scmp.lt.s32.totalorder %s1216_s20, %s1216_s20 }
  0x1f   :  { %764 = vrot.lane.b32.xlu0 %v147_v2, %s1248_s12  ;;  %44 = vst.msk [vmem:[#allocation2 + $0x60] sm:$0xff] %vm31_vm0, %v1418_v31  ;;  %v994_v35 = vld [vmem:[%s1940_s0 + $0x170] sm:$0xff]  ;;  %v1009_v38 = vld [vmem:[%s1940_s0 + $0x280] sm:$0xff] }
  0x20   :  { %v151_v36 = vld [vmem:[%s1940_s0 + $0x51] sm:$0xff]  ;;  %v1025_v40 = vld [vmem:[%s1940_s0 + $0x3a0] sm:$0xff]  ;;  %p1223_p3 = por %p1222_p2, %p1221_p1 }
  0x21   :  { %v1010_v37 = vld [vmem:[%s1940_s0 + $0x290] sm:$0xff]  ;;  %v1041_v42 = vld [vmem:[%s1940_s0 + $0x281] sm:$0xff] }
  0x22   :  { %87 = vrot.lane.b32.xlu1 %v992_v23, %s1241_s17  ;;  %v1026_v39 = vld [vmem:[%s1940_s0 + $0x3b0] sm:$0xff]  ;;  %v1483_v44 = vld [vmem:[%s1940_s0 + $0xe0] sm:$0xff]  ;;  %p1224_p4 = pnand %p1223_p3, %p1217_p0 }
  0x23   :  { %85 = vrot.lane.b32.xlu0 %v1070_v18, %s1241_s17  ;;  %v1042_v41 = vld [vmem:[%s1940_s0 + $0x291] sm:$0xff]  ;;  %45 = vst.msk [vmem:[#allocation2 + $0x68] sm:$0xff] %vm31_vm0, %v1483_v44  ;;  %v1074_v45 = vld [vmem:[%s1940_s0 + $0x180] sm:$0xff] }
  0x24   :  { %v1478_v43 = vld [vmem:[%s1940_s0 + $0xf0] sm:$0xff]  ;;  %v1090_v46 = vld [vmem:[%s1940_s0 + $0x61] sm:$0xff] }
  0x25   :  { %46 = vst.msk [vmem:[#allocation2 + $0x70] sm:$0xff] %vm31_vm0, %v1478_v43  ;;  %v996_v47 = vld [vmem:[%s1940_s0 + $0x190] sm:$0xff]  ;;  %v1011_v50 = vld [vmem:[%s1940_s0 + $0x2a0] sm:$0xff] }
  0x26   :  { %184 = vrot.lane.b32.xlu1 %v149_v24, %s1240_s16  ;;  %v153_v48 = vld [vmem:[%s1940_s0 + $0x71] sm:$0xff]  ;;  %v1027_v52 = vld [vmem:[%s1940_s0 + $0x3c0] sm:$0xff] }
  0x27   :  { %182 = vrot.lane.b32.xlu0 %v1086_v21, %s1240_s16  ;;  %v1012_v49 = vld [vmem:[%s1940_s0 + $0x2b0] sm:$0xff]  ;;  %v1043_v54 = vld [vmem:[%s1940_s0 + $0x2a1] sm:$0xff] }
  0x28   :  { %v1028_v51 = vld [vmem:[%s1940_s0 + $0x3d0] sm:$0xff]  ;;  %v1060_v55 = vld [vmem:[%s1940_s0 + $0x80] sm:$0xff] }
  0x29   :  { %v1044_v53 = vld [vmem:[%s1940_s0 + $0x2b1] sm:$0xff]  ;;  %v1548_v59 = vld [vmem:[%s1940_s0 + $0x100] sm:$0xff] }
  0x2a   :  { %282 = vrot.lane.b32.xlu1 %v1008_v25, %s1242_s7  ;;  %v23_v56 = vld [vmem:[%s1940_s0 + $0x90] sm:$0xff]  ;;  %47 = vst.msk [vmem:[#allocation2 + $0x78] sm:$0xff] %vm31_vm0, %v1548_v59  ;;  %v1076_v60 = vld [vmem:[%s1940_s0 + $0x1a0] sm:$0xff] }
  0x2b   :  { %280 = vrot.lane.b32.xlu0 %v1007_v26, %s1242_s7  ;;  %40 = vst.msk [vmem:[#allocation2 + $0x40] sm:$0xff] %vm31_vm0, %v23_v56  ;;  %v1092_v63 = vld [vmem:[%s1940_s0 + $0x81] sm:$0xff]  ;;  %v997_v3 = vld [vmem:[%s1940_s0 + $0x1b0] sm:$0xff] }
  0x2c   :  { %v998_v2 = vld [vmem:[%s1940_s0 + $0x1c0] sm:$0xff]  ;;  %v154_v7 = vld [vmem:[%s1940_s0 + $0x91] sm:$0xff] }
  0x2d   :  { %v155_v6 = vld [vmem:[%s1940_s0 + $0xa1] sm:$0xff]  ;;  %v1013_v11 = vld [vmem:[%s1940_s0 + $0x2d0] sm:$0xff] }
  0x2e   :  { %380 = vrot.lane.b32.xlu1 %v1024_v27, %s1243_s18  ;;  %v1014_v10 = vld [vmem:[%s1940_s0 + $0x2e0] sm:$0xff]  ;;  %v1029_v15 = vld [vmem:[%s1940_s0 + $0x3f0] sm:$0xff] }
  0x2f   :  { %378 = vrot.lane.b32.xlu0 %v1023_v28, %s1243_s18  ;;  %v1030_v14 = vld [vmem:[%s1940_s0 + $0x400] sm:$0xff]  ;;  %v1045_v21 = vld [vmem:[%s1940_s0 + $0x2d1] sm:$0xff] }
  0x30   :  { %v1046_v18 = vld [vmem:[%s1940_s0 + $0x2e1] sm:$0xff]  ;;  %v1078_v27 = vld [vmem:[%s1940_s0 + $0x1d0] sm:$0xff] }
  0x32   :  { %477 = vrot.lane.b32.xlu1 %v1040_v29, %s1244_s25 }
  0x33   :  { %475 = vrot.lane.b32.xlu0 %v1039_v30, %s1244_s25 }
  0x36   :  { %575 = vrot.lane.b32.xlu1 %v1056_v8, %s1245_s28 }
  0x37   :  { %573 = vrot.lane.b32.xlu0 %v1055_v9, %s1245_s28 }
  0x3a   :  { %673 = vrot.lane.b32.xlu1 %v1072_v33, %s1246_s9 }
  0x3b   :  { %671 = vrot.lane.b32.xlu0 %v992_v23, %s1246_s9 }
  0x3e   :  { %770 = vrot.lane.b32.xlu1 %v1088_v34, %s1248_s12 }
  0x3f   :  { %768 = vrot.lane.b32.xlu0 %v149_v24, %s1248_s12 }
  0x42   :  { %91 = vrot.lane.b32.xlu1 %v994_v35, %s1241_s17 }
  0x43   :  { %89 = vrot.lane.b32.xlu0 %v1072_v33, %s1241_s17 }
  0x46   :  { %188 = vrot.lane.b32.xlu1 %v151_v36, %s1240_s16 }
  0x47   :  { %186 = vrot.lane.b32.xlu0 %v1088_v34, %s1240_s16 }
  0x4a   :  { %286 = vrot.lane.b32.xlu1 %v1010_v37, %s1242_s7  ;;  %v1000_v37 = vld [vmem:[%s1940_s0 + $0x1e0] sm:$0xff] }
  0x4b   :  { %284 = vrot.lane.b32.xlu0 %v1009_v38, %s1242_s7 }
  0x4e   :  { %384 = vrot.lane.b32.xlu1 %v1026_v39, %s1243_s18 }
  0x4f   :  { %382 = vrot.lane.b32.xlu0 %v1025_v40, %s1243_s18  ;;  %v157_v40 = vld [vmem:[%s1940_s0 + $0xc1] sm:$0xff] }
  0x52   :  { %481 = vrot.lane.b32.xlu1 %v1042_v41, %s1244_s25 }
  0x53   :  { %479 = vrot.lane.b32.xlu0 %v1041_v42, %s1244_s25 }
  0x56   :  { %579 = vrot.lane.b32.xlu1 %v1322_v12, %s1245_s28 }
  0x57   :  { %577 = vrot.lane.b32.xlu0 %v1327_v13, %s1245_s28 }
  0x5a   :  { %677 = vrot.lane.b32.xlu1 %v1074_v45, %s1246_s9 }
  0x5b   :  { %675 = vrot.lane.b32.xlu0 %v994_v35, %s1246_s9 }
  0x5e   :  { %774 = vrot.lane.b32.xlu1 %v1090_v46, %s1248_s12 }
  0x5f   :  { %772 = vrot.lane.b32.xlu0 %v151_v36, %s1248_s12 }
  0x62   :  { %95 = vrot.lane.b32.xlu1 %v996_v47, %s1241_s17 }
  0x63   :  { %93 = vrot.lane.b32.xlu0 %v1074_v45, %s1241_s17  ;;  %v1016_v45 = vld [vmem:[%s1940_s0 + $0x300] sm:$0xff] }
  0x66   :  { %192 = vrot.lane.b32.xlu1 %v153_v48, %s1240_s16 }
  0x67   :  { %190 = vrot.lane.b32.xlu0 %v1090_v46, %s1240_s16  ;;  %v1015_v46 = vld [vmem:[%s1940_s0 + $0x2f0] sm:$0xff] }
  0x6a   :  { %290 = vrot.lane.b32.xlu1 %v1012_v49, %s1242_s7  ;;  %v1032_v49 = vld [vmem:[%s1940_s0 + $0x420] sm:$0xff] }
  0x6b   :  { %288 = vrot.lane.b32.xlu0 %v1011_v50, %s1242_s7  ;;  %v1031_v50 = vld [vmem:[%s1940_s0 + $0x410] sm:$0xff] }
  0x6e   :  { %388 = vrot.lane.b32.xlu1 %v1028_v51, %s1243_s18 }
  0x6f   :  { %386 = vrot.lane.b32.xlu0 %v1027_v52, %s1243_s18 }
  0x72   :  { %485 = vrot.lane.b32.xlu1 %v1044_v53, %s1244_s25  ;;  %v1048_v53 = vld [vmem:[%s1940_s0 + $0x301] sm:$0xff] }
  0x73   :  { %483 = vrot.lane.b32.xlu0 %v1043_v54, %s1244_s25  ;;  %v1047_v54 = vld [vmem:[%s1940_s0 + $0x2f1] sm:$0xff] }
  0x74   :  { %v179_v57 = vpop.permute.xlu1 %178 }
  0x75   :  { %v82_v58 = vpop.permute.xlu0 %81 }
  0x76   :  { %130 = vst.msk [vmem:[#allocation2] sm:$0xff] %vm129_vm1, %v82_v58  ;;  %583 = vrot.lane.b32.xlu1 %v1060_v55, %s1245_s28 }
  0x77   :  { %581 = vrot.lane.b32.xlu0 %v1350_v17, %s1245_s28  ;;  %227 = vst.msk [vmem:[#allocation2] sm:$0xff] %vm226_vm2, %v179_v57 }
  0x78   :  { %v181_v61 = vpop.permute.xlu1 %180 }
  0x79   :  { %v84_v62 = vpop.permute.xlu0 %83 }
  0x7a   :  { %131 = vst.msk [vmem:[#allocation2 + $0x8] sm:$0xff] %vm129_vm1, %v84_v62  ;;  %681 = vrot.lane.b32.xlu1 %v1076_v60, %s1246_s9  ;;  %v1080_v60 = vld [vmem:[%s1940_s0 + $0x1f0] sm:$0xff] }
  0x7b   :  { %679 = vrot.lane.b32.xlu0 %v996_v47, %s1246_s9  ;;  %228 = vst.msk [vmem:[#allocation2 + $0x8] sm:$0xff] %vm226_vm2, %v181_v61 }
  0x7c   :  { %v279_v0 = vpop.permute.xlu1 %278 }
  0x7d   :  { %v277_v1 = vpop.permute.xlu0 %276  ;;  %326 = vst.msk [vmem:[#allocation2 + $0x8] sm:$0xff] %vm324_vm3, %v279_v0 }
  0x7e   :  { %325 = vst.msk [vmem:[#allocation2] sm:$0xff] %vm324_vm3, %v277_v1  ;;  %778 = vrot.lane.b32.xlu1 %v1092_v63, %s1248_s12 }
  0x7f   :  { %776 = vrot.lane.b32.xlu0 %v153_v48, %s1248_s12 }
  0x80   :  { %v377_v4 = vpop.permute.xlu1 %376 }
  0x81   :  { %v375_v5 = vpop.permute.xlu0 %374  ;;  %424 = vst.msk [vmem:[#allocation2 + $0x8] sm:$0xff] %vm422_vm4, %v377_v4 }
  0x82   :  { %423 = vst.msk [vmem:[#allocation2] sm:$0xff] %vm422_vm4, %v375_v5  ;;  %99 = vrot.lane.b32.xlu1 %v998_v2, %s1241_s17 }
  0x83   :  { %97 = vrot.lane.b32.xlu0 %v997_v3, %s1241_s17  ;;  %v1002_v3 = vld [vmem:[%s1940_s0 + $0x200] sm:$0xff] }
  0x84   :  { %v474_v8 = vpop.permute.xlu1 %473 }
  0x85   :  { %v472_v9 = vpop.permute.xlu0 %471  ;;  %521 = vst.msk [vmem:[#allocation2 + $0x8] sm:$0xff] %vm519_vm5, %v474_v8 }
  0x86   :  { %520 = vst.msk [vmem:[#allocation2] sm:$0xff] %vm519_vm5, %v472_v9  ;;  %196 = vrot.lane.b32.xlu1 %v155_v6, %s1240_s16  ;;  %v1018_v9 = vld [vmem:[%s1940_s0 + $0x320] sm:$0xff] }
  0x87   :  { %194 = vrot.lane.b32.xlu0 %v154_v7, %s1240_s16 }
  0x88   :  { %v572_v12 = vpop.permute.xlu1 %571 }
  0x89   :  { %v570_v13 = vpop.permute.xlu0 %569  ;;  %619 = vst.msk [vmem:[#allocation2 + $0x8] sm:$0xff] %vm617_vm6, %v572_v12 }
  0x8a   :  { %618 = vst.msk [vmem:[#allocation2] sm:$0xff] %vm617_vm6, %v570_v13  ;;  %294 = vrot.lane.b32.xlu1 %v1014_v10, %s1242_s7  ;;  %v1017_v10 = vld [vmem:[%s1940_s0 + $0x310] sm:$0xff]  ;;  %v1034_v13 = vld [vmem:[%s1940_s0 + $0x440] sm:$0xff] }
  0x8b   :  { %292 = vrot.lane.b32.xlu0 %v1013_v11, %s1242_s7 }
  0x8c   :  { %v670_v16 = vpop.permute.xlu1 %669 }
  0x8d   :  { %v668_v17 = vpop.permute.xlu0 %667  ;;  %717 = vst.msk [vmem:[#allocation2 + $0x8] sm:$0xff] %vm715_vm7, %v670_v16 }
  0x8e   :  { %716 = vst.msk [vmem:[#allocation2] sm:$0xff] %vm715_vm7, %v668_v17  ;;  %392 = vrot.lane.b32.xlu1 %v1030_v14, %s1243_s18  ;;  %v1033_v14 = vld [vmem:[%s1940_s0 + $0x430] sm:$0xff]  ;;  %v1050_v17 = vld [vmem:[%s1940_s0 + $0x321] sm:$0xff] }
  0x8f   :  { %390 = vrot.lane.b32.xlu0 %v1029_v15, %s1243_s18 }
  0x90   :  { %v767_v23 = vpop.permute.xlu1 %766 }
  0x91   :  { %v765_v24 = vpop.permute.xlu0 %764  ;;  %814 = vst.msk [vmem:[#allocation2 + $0x8] sm:$0xff] %vm812_vm8, %v767_v23 }
  0x92   :  { %813 = vst.msk [vmem:[#allocation2] sm:$0xff] %vm812_vm8, %v765_v24  ;;  %489 = vrot.lane.b32.xlu1 %v1046_v18, %s1244_s25  ;;  %v1049_v18 = vld [vmem:[%s1940_s0 + $0x311] sm:$0xff] }
  0x93   :  { %487 = vrot.lane.b32.xlu0 %v1045_v21, %s1244_s25 }
  0x94   :  { %v88_v25 = vpop.permute.xlu1 %87 }
  0x95   :  { %v86_v26 = vpop.permute.xlu0 %85  ;;  %133 = vst.msk [vmem:[#allocation2 + $0x18] sm:$0xff] %vm129_vm1, %v88_v25 }
  0x96   :  { %132 = vst.msk [vmem:[#allocation2 + $0x10] sm:$0xff] %vm129_vm1, %v86_v26  ;;  %587 = vrot.lane.b32.xlu1 %v1362_v19, %s1245_s28  ;;  %v1082_v26 = vld [vmem:[%s1940_s0 + $0x210] sm:$0xff] }
  0x97   :  { %585 = vrot.lane.b32.xlu0 %v1367_v20, %s1245_s28  ;;  %v1094_v20 = vld [vmem:[%s1940_s0 + $0xb1] sm:$0xff] }
  0x98   :  { %v185_v28 = vpop.permute.xlu1 %184  ;;  %v830_v33 = vld [vmem:[#allocation2 + $0x8] sm:$0xff] }
  0x99   :  { %v183_v29 = vpop.permute.xlu0 %182  ;;  %v829_v30 = vld [vmem:[#allocation2] sm:$0xff]  ;;  %230 = vst.msk [vmem:[#allocation2 + $0x18] sm:$0xff] %vm226_vm2, %v185_v28 }
  0x9a   :  { %229 = vst.msk [vmem:[#allocation2 + $0x10] sm:$0xff] %vm226_vm2, %v183_v29  ;;  %v1171_v19 = vpack.c.bf16 %v830_v33, %v829_v30  ;;  %685 = vrot.lane.b32.xlu1 %v1078_v27, %s1246_s9 }
  0x9b   :  { %683 = vrot.lane.b32.xlu0 %v998_v2, %s1246_s9 }
  0x9c   :  { %1173 = vmatpush3.bf16.xpose.msk.msra.mxu0 %vm1631_vm10, %v1171_v19  ;;  %v283_v35 = vpop.permute.xlu1 %282 }
  0x9d   :  { %v281_v36 = vpop.permute.xlu0 %280  ;;  %1174 = vmatprep.subr.bf16.mxu0 %v1247_v22  ;;  %328 = vst.msk [vmem:[#allocation2 + $0x18] sm:$0xff] %vm324_vm3, %v283_v35 }
  0x9e   :  { %327 = vst.msk [vmem:[#allocation2 + $0x10] sm:$0xff] %vm324_vm3, %v281_v36  ;;  %782 = vrot.lane.b32.xlu1 %v1094_v20, %s1248_s12 }
  0x9f   :  { %780 = vrot.lane.b32.xlu0 %v155_v6, %s1248_s12  ;;  %v159_v6 = vld [vmem:[%s1940_s0 + $0xe1] sm:$0xff] }
  0xa0   :  { %v381_v38 = vpop.permute.xlu1 %380 }
  0xa1   :  { %v379_v39 = vpop.permute.xlu0 %378  ;;  %426 = vst.msk [vmem:[#allocation2 + $0x18] sm:$0xff] %vm422_vm4, %v381_v38 }
  0xa2   :  { %425 = vst.msk [vmem:[#allocation2 + $0x10] sm:$0xff] %vm422_vm4, %v379_v39  ;;  %103 = vrot.lane.b32.xlu1 %v1000_v37, %s1241_s17 }
  0xa3   :  { %101 = vrot.lane.b32.xlu0 %v1078_v27, %s1241_s17 }
  0xa4   :  { %v478_v41 = vpop.permute.xlu1 %477 }
  0xa5   :  { %v476_v42 = vpop.permute.xlu0 %475  ;;  %523 = vst.msk [vmem:[#allocation2 + $0x18] sm:$0xff] %vm519_vm5, %v478_v41  ;;  %v1019_v41 = vld [vmem:[%s1940_s0 + $0x330] sm:$0xff] }
  0xa6   :  { %522 = vst.msk [vmem:[#allocation2 + $0x10] sm:$0xff] %vm519_vm5, %v476_v42  ;;  %200 = vrot.lane.b32.xlu1 %v157_v40, %s1240_s16 }
  0xa7   :  { %198 = vrot.lane.b32.xlu0 %v1094_v20, %s1240_s16  ;;  %v1004_v20 = vld [vmem:[%s1940_s0 + $0x220] sm:$0xff] }
  0xa8   :  { %v576_v47 = vpop.permute.xlu1 %575 }
  0xa9   :  { %v574_v48 = vpop.permute.xlu0 %573  ;;  %621 = vst.msk [vmem:[#allocation2 + $0x18] sm:$0xff] %vm617_vm6, %v576_v47  ;;  %v1035_v47 = vld [vmem:[%s1940_s0 + $0x450] sm:$0xff] }
  0xaa   :  { %620 = vst.msk [vmem:[#allocation2 + $0x10] sm:$0xff] %vm617_vm6, %v574_v48  ;;  %298 = vrot.lane.b32.xlu1 %v1016_v45, %s1242_s7 }
  0xab   :  { %296 = vrot.lane.b32.xlu0 %v1015_v46, %s1242_s7  ;;  %v1036_v46 = vld [vmem:[%s1940_s0 + $0x460] sm:$0xff] }
  0xac   :  { %v674_v51 = vpop.permute.xlu1 %673 }
  0xad   :  { %v672_v52 = vpop.permute.xlu0 %671  ;;  %719 = vst.msk [vmem:[#allocation2 + $0x18] sm:$0xff] %vm715_vm7, %v674_v51  ;;  %v1051_v51 = vld [vmem:[%s1940_s0 + $0x331] sm:$0xff] }
  0xae   :  { %718 = vst.msk [vmem:[#allocation2 + $0x10] sm:$0xff] %vm715_vm7, %v672_v52  ;;  %396 = vrot.lane.b32.xlu1 %v1032_v49, %s1243_s18 }
  0xaf   :  { %394 = vrot.lane.b32.xlu0 %v1031_v50, %s1243_s18  ;;  %v1052_v50 = vld [vmem:[%s1940_s0 + $0x341] sm:$0xff] }
  0xb0   :  { %v771_v55 = vpop.permute.xlu1 %770 }
  0xb1   :  { %v769_v56 = vpop.permute.xlu0 %768  ;;  %816 = vst.msk [vmem:[#allocation2 + $0x18] sm:$0xff] %vm812_vm8, %v771_v55 }
  0xb2   :  { %815 = vst.msk [vmem:[#allocation2 + $0x10] sm:$0xff] %vm812_vm8, %v769_v56  ;;  %493 = vrot.lane.b32.xlu1 %v1048_v53, %s1244_s25 }
  0xb3   :  { %491 = vrot.lane.b32.xlu0 %v1047_v54, %s1244_s25  ;;  %v1068_v54 = vld [vmem:[%s1940_s0 + $0x110] sm:$0xff] }
  0xb4   :  { %v92_v57 = vpop.permute.xlu1 %91 }
  0xb5   :  { %v90_v58 = vpop.permute.xlu0 %89  ;;  %135 = vst.msk [vmem:[#allocation2 + $0x28] sm:$0xff] %vm129_vm1, %v92_v57  ;;  %v1084_v57 = vld [vmem:[%s1940_s0 + $0x230] sm:$0xff] }
  0xb6   :  { %134 = vst.msk [vmem:[#allocation2 + $0x20] sm:$0xff] %vm129_vm1, %v90_v58  ;;  %591 = vrot.lane.b32.xlu1 %v1418_v31, %s1245_s28  ;;  %v1096_v31 = vld [vmem:[%s1940_s0 + $0xd1] sm:$0xff] }
  0xb7   :  { %589 = vrot.lane.b32.xlu0 %v1423_v32, %s1245_s28 }
  0xb8   :  { %v189_v61 = vpop.permute.xlu1 %188  ;;  %v832_v0 = vld [vmem:[#allocation2 + $0x18] sm:$0xff] }
  0xb9   :  { %v187_v62 = vpop.permute.xlu0 %186  ;;  %v831_v63 = vld [vmem:[#allocation2 + $0x10] sm:$0xff]  ;;  %232 = vst.msk [vmem:[#allocation2 + $0x28] sm:$0xff] %vm226_vm2, %v189_v61 }
  0xba   :  { %231 = vst.msk [vmem:[#allocation2 + $0x20] sm:$0xff] %vm226_vm2, %v187_v62  ;;  %v1175_v1 = vpack.c.bf16 %v832_v0, %v831_v63  ;;  %689 = vrot.lane.b32.xlu1 %v1080_v60, %s1246_s9 }
  0xbb   :  { %687 = vrot.lane.b32.xlu0 %v1000_v37, %s1246_s9  ;;  %v161_v37 = vld [vmem:[%s1940_s0 + $0x101] sm:$0xff] }
  0xbc   :  { %1177 = vmatpush3.bf16.xpose.msk.msra.mxu0 %vm1631_vm10, %v1175_v1  ;;  %v287_v32 = vpop.permute.xlu1 %286 }
  0xbd   :  { %v285_v2 = vpop.permute.xlu0 %284  ;;  %1178 = vmatprep.subr.bf16.mxu0 %v1247_v22  ;;  %330 = vst.msk [vmem:[#allocation2 + $0x28] sm:$0xff] %vm324_vm3, %v287_v32 }
  0xbe   :  { %329 = vst.msk [vmem:[#allocation2 + $0x20] sm:$0xff] %vm324_vm3, %v285_v2  ;;  %786 = vrot.lane.b32.xlu1 %v1096_v31, %s1248_s12 }
  0xbf   :  { %784 = vrot.lane.b32.xlu0 %v157_v40, %s1248_s12  ;;  %v1020_v40 = vld [vmem:[%s1940_s0 + $0x340] sm:$0xff] }
  0xc0   :  { %v385_v4 = vpop.permute.xlu1 %384 }
  0xc1   :  { %v383_v5 = vpop.permute.xlu0 %382  ;;  %428 = vst.msk [vmem:[#allocation2 + $0x28] sm:$0xff] %vm422_vm4, %v385_v4  ;;  %v1251_v4 = vmov 0  }
  0xc2   :  { %427 = vst.msk [vmem:[#allocation2 + $0x20] sm:$0xff] %vm422_vm4, %v383_v5  ;;  %107 = vrot.lane.b32.xlu1 %v1002_v3, %s1241_s17  ;;  %1215 = vset.pattern.permute.xlu0 %v1251_v4 }
  0xc3   :  { %105 = vrot.lane.b32.xlu0 %v1080_v60, %s1241_s17 }
  0xc4   :  { %v482_v7 = vpop.permute.xlu1 %481 }
  0xc5   :  { %v480_v8 = vpop.permute.xlu0 %479  ;;  %525 = vst.msk [vmem:[#allocation2 + $0x28] sm:$0xff] %vm519_vm5, %v482_v7 }
  0xc6   :  { %524 = vst.msk [vmem:[#allocation2 + $0x20] sm:$0xff] %vm519_vm5, %v480_v8  ;;  %204 = vrot.lane.b32.xlu1 %v159_v6, %s1240_s16 }
  0xc7   :  { %202 = vrot.lane.b32.xlu0 %v1096_v31, %s1240_s16  ;;  %v1250_v31 = vmov 0.0  }
  0xc8   :  { %v580_v11 = vpop.permute.xlu1 %579  ;;  %1167 = vmatprep.mubr.msk.f32.mxu0 %vm1249_vm11, %v1250_v31 }
  0xc9   :  { %v578_v12 = vpop.permute.xlu0 %577  ;;  %623 = vst.msk [vmem:[#allocation2 + $0x28] sm:$0xff] %vm617_vm6, %v580_v11 }
  0xca   :  { %622 = vst.msk [vmem:[#allocation2 + $0x20] sm:$0xff] %vm617_vm6, %v578_v12  ;;  %302 = vrot.lane.b32.xlu1 %v1018_v9, %s1242_s7 }
  0xcb   :  { %300 = vrot.lane.b32.xlu0 %v1017_v10, %s1242_s7 }
  0xcc   :  { %v678_v15 = vpop.permute.xlu1 %677 }
  0xcd   :  { %v676_v16 = vpop.permute.xlu0 %675  ;;  %721 = vst.msk [vmem:[#allocation2 + $0x28] sm:$0xff] %vm715_vm7, %v678_v15 }
  0xce   :  { %720 = vst.msk [vmem:[#allocation2 + $0x20] sm:$0xff] %vm715_vm7, %v676_v16  ;;  %400 = vrot.lane.b32.xlu1 %v1034_v13, %s1243_s18 }
  0xcf   :  { %398 = vrot.lane.b32.xlu0 %v1033_v14, %s1243_s18 }
  0xd0   :  { %v775_v21 = vpop.permute.xlu1 %774 }
  0xd1   :  { %v773_v23 = vpop.permute.xlu0 %772  ;;  %818 = vst.msk [vmem:[#allocation2 + $0x28] sm:$0xff] %vm812_vm8, %v775_v21 }
  0xd2   :  { %817 = vst.msk [vmem:[#allocation2 + $0x20] sm:$0xff] %vm812_vm8, %v773_v23  ;;  %497 = vrot.lane.b32.xlu1 %v1050_v17, %s1244_s25 }
  0xd3   :  { %495 = vrot.lane.b32.xlu0 %v1049_v18, %s1244_s25 }
  0xd4   :  { %v96_v24 = vpop.permute.xlu1 %95 }
  0xd5   :  { %v94_v25 = vpop.permute.xlu0 %93  ;;  %137 = vst.msk [vmem:[#allocation2 + $0x38] sm:$0xff] %vm129_vm1, %v96_v24 }
  0xd6   :  { %136 = vst.msk [vmem:[#allocation2 + $0x30] sm:$0xff] %vm129_vm1, %v94_v25  ;;  %595 = vrot.lane.b32.xlu1 %v1478_v43, %s1245_s28  ;;  %v1098_v43 = vld [vmem:[%s1940_s0 + $0xf1] sm:$0xff] }
  0xd7   :  { %593 = vrot.lane.b32.xlu0 %v1483_v44, %s1245_s28 }
  0xd8   :  { %v193_v27 = vpop.permute.xlu1 %192  ;;  %v834_v30 = vld [vmem:[#allocation2 + $0x28] sm:$0xff] }
  0xd9   :  { %v191_v28 = vpop.permute.xlu0 %190  ;;  %v833_v29 = vld [vmem:[#allocation2 + $0x20] sm:$0xff]  ;;  %234 = vst.msk [vmem:[#allocation2 + $0x38] sm:$0xff] %vm226_vm2, %v193_v27 }
  0xda   :  { %233 = vst.msk [vmem:[#allocation2 + $0x30] sm:$0xff] %vm226_vm2, %v191_v28  ;;  %v1179_v33 = vpack.c.bf16 %v834_v30, %v833_v29  ;;  %693 = vrot.lane.b32.xlu1 %v1082_v26, %s1246_s9 }
  0xdb   :  { %691 = vrot.lane.b32.xlu0 %v1002_v3, %s1246_s9  ;;  %v846_v3 = vld [vmem:[%s1942_s2] sm:$0xff] }
  0xdc   :  { %1181 = vmatpush3.bf16.xpose.msk.msra.mxu0 %vm1631_vm10, %v1179_v33  ;;  %v291_v44 = vpop.permute.xlu1 %290 }
  0xdd   :  { %v289_v19 = vpop.permute.xlu0 %288  ;;  %1182 = vmatprep.subr.bf16.mxu0 %v1247_v22  ;;  %332 = vst.msk [vmem:[#allocation2 + $0x38] sm:$0xff] %vm324_vm3, %v291_v44 }
  0xde   :  { %331 = vst.msk [vmem:[#allocation2 + $0x30] sm:$0xff] %vm324_vm3, %v289_v19  ;;  %790 = vrot.lane.b32.xlu1 %v1098_v43, %s1248_s12 }
  0xdf   :  { %788 = vrot.lane.b32.xlu0 %v159_v6, %s1248_s12 }
  0xe0   :  { %v389_v35 = vpop.permute.xlu1 %388 }
  0xe1   :  { %v387_v36 = vpop.permute.xlu0 %386  ;;  %430 = vst.msk [vmem:[#allocation2 + $0x38] sm:$0xff] %vm422_vm4, %v389_v35 }
  0xe2   :  { %429 = vst.msk [vmem:[#allocation2 + $0x30] sm:$0xff] %vm422_vm4, %v387_v36  ;;  %111 = vrot.lane.b32.xlu1 %v1004_v20, %s1241_s17 }
  0xe3   :  { %109 = vrot.lane.b32.xlu0 %v1082_v26, %s1241_s17 }
  0xe4   :  { %v486_v38 = vpop.permute.xlu1 %485 }
  0xe5   :  { %v484_v39 = vpop.permute.xlu0 %483  ;;  %527 = vst.msk [vmem:[#allocation2 + $0x38] sm:$0xff] %vm519_vm5, %v486_v38 }
  0xe6   :  { %526 = vst.msk [vmem:[#allocation2 + $0x30] sm:$0xff] %vm519_vm5, %v484_v39  ;;  %208 = vrot.lane.b32.xlu1 %v161_v37, %s1240_s16 }
  0xe7   :  { %206 = vrot.lane.b32.xlu0 %v1098_v43, %s1240_s16 }
  0xe8   :  { %v584_v42 = vpop.permute.xlu1 %583 }
  0xe9   :  { %v582_v45 = vpop.permute.xlu0 %581  ;;  %625 = vst.msk [vmem:[#allocation2 + $0x38] sm:$0xff] %vm617_vm6, %v584_v42 }
  0xea   :  { %624 = vst.msk [vmem:[#allocation2 + $0x30] sm:$0xff] %vm617_vm6, %v582_v45  ;;  %306 = vrot.lane.b32.xlu1 %v1020_v40, %s1242_s7 }
  0xeb   :  { %304 = vrot.lane.b32.xlu0 %v1019_v41, %s1242_s7 }
  0xec   :  { %v682_v48 = vpop.permute.xlu1 %681 }
  0xed   :  { %v680_v49 = vpop.permute.xlu0 %679  ;;  %723 = vst.msk [vmem:[#allocation2 + $0x38] sm:$0xff] %vm715_vm7, %v682_v48 }
  0xee   :  { %722 = vst.msk [vmem:[#allocation2 + $0x30] sm:$0xff] %vm715_vm7, %v680_v49  ;;  %404 = vrot.lane.b32.xlu1 %v1036_v46, %s1243_s18 }
  0xef   :  { %402 = vrot.lane.b32.xlu0 %v1035_v47, %s1243_s18 }
  0xf0   :  { %v779_v52 = vpop.permute.xlu1 %778 }
  0xf1   :  { %v777_v53 = vpop.permute.xlu0 %776  ;;  %820 = vst.msk [vmem:[#allocation2 + $0x38] sm:$0xff] %vm812_vm8, %v779_v52 }
  0xf2   :  { %819 = vst.msk [vmem:[#allocation2 + $0x30] sm:$0xff] %vm812_vm8, %v777_v53  ;;  %501 = vrot.lane.b32.xlu1 %v1052_v50, %s1244_s25 }
  0xf3   :  { %499 = vrot.lane.b32.xlu0 %v1051_v51, %s1244_s25 }
  0xf4   :  { %v100_v55 = vpop.permute.xlu1 %99 }
  0xf5   :  { %v98_v56 = vpop.permute.xlu0 %97  ;;  %139 = vst.msk [vmem:[#allocation2 + $0x48] sm:$0xff] %vm129_vm1, %v100_v55 }
  0xf6   :  { %138 = vst.msk [vmem:[#allocation2 + $0x40] sm:$0xff] %vm129_vm1, %v98_v56  ;;  %599 = vrot.lane.b32.xlu1 %v1068_v54, %s1245_s28 }
  0xf7   :  { %597 = vrot.lane.b32.xlu0 %v1548_v59, %s1245_s28  ;;  %v1100_v59 = vld [vmem:[%s1940_s0 + $0x111] sm:$0xff] }
  0xf8   :  { %v197_v58 = vpop.permute.xlu1 %196  ;;  %v836_v62 = vld [vmem:[#allocation2 + $0x38] sm:$0xff] }
  0xf9   :  { %v195_v60 = vpop.permute.xlu0 %194  ;;  %v835_v61 = vld [vmem:[#allocation2 + $0x30] sm:$0xff]  ;;  %236 = vst.msk [vmem:[#allocation2 + $0x48] sm:$0xff] %vm226_vm2, %v197_v58 }
  0xfa   :  { %235 = vst.msk [vmem:[#allocation2 + $0x40] sm:$0xff] %vm226_vm2, %v195_v60  ;;  %v1183_v63 = vpack.c.bf16 %v836_v62, %v835_v61  ;;  %697 = vrot.lane.b32.xlu1 %v1084_v57, %s1246_s9 }
  0xfb   :  { %695 = vrot.lane.b32.xlu0 %v1004_v20, %s1246_s9 }
  0xfc   :  { %1185 = vmatpush3.bf16.xpose.msk.msra.mxu0 %vm1631_vm10, %v1183_v63  ;;  %v295_v0 = vpop.permute.xlu1 %294 }
  0xfd   :  { %v293_v1 = vpop.permute.xlu0 %292  ;;  %1186 = vmatprep.subr.bf16.mxu0 %v1247_v22  ;;  %334 = vst.msk [vmem:[#allocation2 + $0x48] sm:$0xff] %vm324_vm3, %v295_v0 }
  0xfe   :  { %333 = vst.msk [vmem:[#allocation2 + $0x40] sm:$0xff] %vm324_vm3, %v293_v1  ;;  %794 = vrot.lane.b32.xlu1 %v1100_v59, %s1248_s12 }
  0xff   :  { %792 = vrot.lane.b32.xlu0 %v161_v37, %s1248_s12 }
 0x100   :  { %v393_v32 = vpop.permute.xlu1 %392 }
 0x101   :  { %v391_v2 = vpop.permute.xlu0 %390  ;;  %432 = vst.msk [vmem:[#allocation2 + $0x48] sm:$0xff] %vm422_vm4, %v393_v32 }
 0x102   :  { %431 = vst.msk [vmem:[#allocation2 + $0x40] sm:$0xff] %vm422_vm4, %v391_v2 }
 0x103   :  { %849 = vperm.xlu0 %1215, %v846_v3  }
 0x104   :  { %v490_v5 = vpop.permute.xlu1 %489 }
 0x105   :  { %v488_v6 = vpop.permute.xlu0 %487  ;;  %529 = vst.msk [vmem:[#allocation2 + $0x48] sm:$0xff] %vm519_vm5, %v490_v5 }
 0x106   :  { %528 = vst.msk [vmem:[#allocation2 + $0x40] sm:$0xff] %vm519_vm5, %v488_v6 }
 0x108   :  { %v588_v7 = vpop.permute.xlu1 %587 }
 0x109   :  { %v586_v8 = vpop.permute.xlu0 %585  ;;  %627 = vst.msk [vmem:[#allocation2 + $0x48] sm:$0xff] %vm617_vm6, %v588_v7 }
 0x10a   :  { %626 = vst.msk [vmem:[#allocation2 + $0x40] sm:$0xff] %vm617_vm6, %v586_v8 }
 0x10c   :  { %v686_v9 = vpop.permute.xlu1 %685 }
 0x10d   :  { %v684_v10 = vpop.permute.xlu0 %683  ;;  %725 = vst.msk [vmem:[#allocation2 + $0x48] sm:$0xff] %vm715_vm7, %v686_v9 }
 0x10e   :  { %724 = vst.msk [vmem:[#allocation2 + $0x40] sm:$0xff] %vm715_vm7, %v684_v10  ;;  %v845_v10 = vld [vmem:[%s1941_s1] sm:$0xff] }
 0x110   :  { %v783_v11 = vpop.permute.xlu1 %782 }
 0x111   :  { %v781_v12 = vpop.permute.xlu0 %780  ;;  %822 = vst.msk [vmem:[#allocation2 + $0x48] sm:$0xff] %vm812_vm8, %v783_v11 }
 0x112   :  { %821 = vst.msk [vmem:[#allocation2 + $0x40] sm:$0xff] %vm812_vm8, %v781_v12 }
 0x114   :  { %v104_v13 = vpop.permute.xlu1 %103 }
 0x115   :  { %v102_v14 = vpop.permute.xlu0 %101  ;;  %141 = vst.msk [vmem:[#allocation2 + $0x58] sm:$0xff] %vm129_vm1, %v104_v13 }
 0x116   :  { %140 = vst.msk [vmem:[#allocation2 + $0x50] sm:$0xff] %vm129_vm1, %v102_v14 }
 0x118   :  { %v201_v15 = vpop.permute.xlu1 %200  ;;  %v838_v18 = vld [vmem:[#allocation2 + $0x48] sm:$0xff] }
 0x119   :  { %v199_v16 = vpop.permute.xlu0 %198  ;;  %v837_v17 = vld [vmem:[#allocation2 + $0x40] sm:$0xff]  ;;  %238 = vst.msk [vmem:[#allocation2 + $0x58] sm:$0xff] %vm226_vm2, %v201_v15 }
 0x11a   :  { %237 = vst.msk [vmem:[#allocation2 + $0x50] sm:$0xff] %vm226_vm2, %v199_v16  ;;  %v1187_v21 = vpack.c.bf16 %v838_v18, %v837_v17 }
 0x11c   :  { %1189 = vmatpush3.bf16.xpose.msk.msra.mxu0 %vm1631_vm10, %v1187_v21  ;;  %v299_v23 = vpop.permute.xlu1 %298 }
 0x11d   :  { %v297_v24 = vpop.permute.xlu0 %296  ;;  %1190 = vmatprep.subr.bf16.mxu0 %v1247_v22  ;;  %336 = vst.msk [vmem:[#allocation2 + $0x58] sm:$0xff] %vm324_vm3, %v299_v23 }
 0x11e   :  { %335 = vst.msk [vmem:[#allocation2 + $0x50] sm:$0xff] %vm324_vm3, %v297_v24 }
 0x120   :  { %v397_v25 = vpop.permute.xlu1 %396 }
 0x121   :  { %v395_v26 = vpop.permute.xlu0 %394  ;;  %434 = vst.msk [vmem:[#allocation2 + $0x58] sm:$0xff] %vm422_vm4, %v397_v25 }
 0x122   :  { %433 = vst.msk [vmem:[#allocation2 + $0x50] sm:$0xff] %vm422_vm4, %v395_v26 }
 0x124   :  { %v494_v27 = vpop.permute.xlu1 %493 }
 0x125   :  { %v492_v28 = vpop.permute.xlu0 %491  ;;  %531 = vst.msk [vmem:[#allocation2 + $0x58] sm:$0xff] %vm519_vm5, %v494_v27 }
 0x126   :  { %530 = vst.msk [vmem:[#allocation2 + $0x50] sm:$0xff] %vm519_vm5, %v492_v28 }
 0x128   :  { %v592_v29 = vpop.permute.xlu1 %591 }
 0x129   :  { %v590_v30 = vpop.permute.xlu0 %589  ;;  %629 = vst.msk [vmem:[#allocation2 + $0x58] sm:$0xff] %vm617_vm6, %v592_v29 }
 0x12a   :  { %628 = vst.msk [vmem:[#allocation2 + $0x50] sm:$0xff] %vm617_vm6, %v590_v30 }
 0x12c   :  { %v690_v33 = vpop.permute.xlu1 %689 }
 0x12d   :  { %v688_v43 = vpop.permute.xlu0 %687  ;;  %727 = vst.msk [vmem:[#allocation2 + $0x58] sm:$0xff] %vm715_vm7, %v690_v33 }
 0x12e   :  { %726 = vst.msk [vmem:[#allocation2 + $0x50] sm:$0xff] %vm715_vm7, %v688_v43 }
 0x130   :  { %v787_v44 = vpop.permute.xlu1 %786 }
 0x131   :  { %v785_v19 = vpop.permute.xlu0 %784  ;;  %824 = vst.msk [vmem:[#allocation2 + $0x58] sm:$0xff] %vm812_vm8, %v787_v44 }
 0x132   :  { %823 = vst.msk [vmem:[#allocation2 + $0x50] sm:$0xff] %vm812_vm8, %v785_v19 }
 0x134   :  { %v108_v20 = vpop.permute.xlu1 %107 }
 0x135   :  { %v106_v35 = vpop.permute.xlu0 %105  ;;  %143 = vst.msk [vmem:[#allocation2 + $0x68] sm:$0xff] %vm129_vm1, %v108_v20 }
 0x136   :  { %142 = vst.msk [vmem:[#allocation2 + $0x60] sm:$0xff] %vm129_vm1, %v106_v35 }
 0x138   :  { %v205_v36 = vpop.permute.xlu1 %204  ;;  %v840_v39 = vld [vmem:[#allocation2 + $0x58] sm:$0xff] }
 0x139   :  { %v203_v37 = vpop.permute.xlu0 %202  ;;  %v839_v38 = vld [vmem:[#allocation2 + $0x50] sm:$0xff]  ;;  %240 = vst.msk [vmem:[#allocation2 + $0x68] sm:$0xff] %vm226_vm2, %v205_v36 }
 0x13a   :  { %239 = vst.msk [vmem:[#allocation2 + $0x60] sm:$0xff] %vm226_vm2, %v203_v37  ;;  %v1191_v40 = vpack.c.bf16 %v840_v39, %v839_v38 }
 0x13c   :  { %1193 = vmatpush3.bf16.xpose.msk.msra.mxu0 %vm1631_vm10, %v1191_v40  ;;  %v303_v41 = vpop.permute.xlu1 %302 }
 0x13d   :  { %v301_v42 = vpop.permute.xlu0 %300  ;;  %1194 = vmatprep.subr.bf16.mxu0 %v1247_v22  ;;  %338 = vst.msk [vmem:[#allocation2 + $0x68] sm:$0xff] %vm324_vm3, %v303_v41 }
 0x13e   :  { %337 = vst.msk [vmem:[#allocation2 + $0x60] sm:$0xff] %vm324_vm3, %v301_v42 }
 0x140   :  { %v401_v45 = vpop.permute.xlu1 %400 }
 0x141   :  { %v399_v46 = vpop.permute.xlu0 %398  ;;  %436 = vst.msk [vmem:[#allocation2 + $0x68] sm:$0xff] %vm422_vm4, %v401_v45 }
 0x142   :  { %435 = vst.msk [vmem:[#allocation2 + $0x60] sm:$0xff] %vm422_vm4, %v399_v46 }
 0x144   :  { %v498_v47 = vpop.permute.xlu1 %497 }
 0x145   :  { %v496_v48 = vpop.permute.xlu0 %495  ;;  %533 = vst.msk [vmem:[#allocation2 + $0x68] sm:$0xff] %vm519_vm5, %v498_v47 }
 0x146   :  { %532 = vst.msk [vmem:[#allocation2 + $0x60] sm:$0xff] %vm519_vm5, %v496_v48 }
 0x148   :  { %v596_v49 = vpop.permute.xlu1 %595 }
 0x149   :  { %v594_v50 = vpop.permute.xlu0 %593  ;;  %631 = vst.msk [vmem:[#allocation2 + $0x68] sm:$0xff] %vm617_vm6, %v596_v49 }
 0x14a   :  { %630 = vst.msk [vmem:[#allocation2 + $0x60] sm:$0xff] %vm617_vm6, %v594_v50 }
 0x14c   :  { %v694_v51 = vpop.permute.xlu1 %693 }
 0x14d   :  { %v692_v52 = vpop.permute.xlu0 %691  ;;  %729 = vst.msk [vmem:[#allocation2 + $0x68] sm:$0xff] %vm715_vm7, %v694_v51 }
 0x14e   :  { %728 = vst.msk [vmem:[#allocation2 + $0x60] sm:$0xff] %vm715_vm7, %v692_v52 }
 0x150   :  { %v791_v53 = vpop.permute.xlu1 %790 }
 0x151   :  { %v789_v54 = vpop.permute.xlu0 %788  ;;  %826 = vst.msk [vmem:[#allocation2 + $0x68] sm:$0xff] %vm812_vm8, %v791_v53 }
 0x152   :  { %825 = vst.msk [vmem:[#allocation2 + $0x60] sm:$0xff] %vm812_vm8, %v789_v54 }
 0x154   :  { %v112_v55 = vpop.permute.xlu1 %111 }
 0x155   :  { %v110_v56 = vpop.permute.xlu0 %109  ;;  %145 = vst.msk [vmem:[#allocation2 + $0x78] sm:$0xff] %vm129_vm1, %v112_v55 }
 0x156   :  { %144 = vst.msk [vmem:[#allocation2 + $0x70] sm:$0xff] %vm129_vm1, %v110_v56 }
 0x158   :  { %v209_v57 = vpop.permute.xlu1 %208  ;;  %v842_v61 = vld [vmem:[#allocation2 + $0x68] sm:$0xff] }
 0x159   :  { %v207_v58 = vpop.permute.xlu0 %206  ;;  %v841_v60 = vld [vmem:[#allocation2 + $0x60] sm:$0xff]  ;;  %242 = vst.msk [vmem:[#allocation2 + $0x78] sm:$0xff] %vm226_vm2, %v209_v57 }
 0x15a   :  { %241 = vst.msk [vmem:[#allocation2 + $0x70] sm:$0xff] %vm226_vm2, %v207_v58  ;;  %v1195_v62 = vpack.c.bf16 %v842_v61, %v841_v60 }
 0x15c   :  { %1197 = vmatpush3.bf16.xpose.msk.msra.mxu0 %vm1631_vm10, %v1195_v62  ;;  %v307_v63 = vpop.permute.xlu1 %306 }
 0x15d   :  { %v305_v59 = vpop.permute.xlu0 %304  ;;  %1198 = vmatprep.subr.bf16.mxu0 %v1247_v22  ;;  %340 = vst.msk [vmem:[#allocation2 + $0x78] sm:$0xff] %vm324_vm3, %v307_v63 }
 0x15e   :  { %339 = vst.msk [vmem:[#allocation2 + $0x70] sm:$0xff] %vm324_vm3, %v305_v59 }
 0x160   :  { %v405_v0 = vpop.permute.xlu1 %404 }
 0x161   :  { %v403_v1 = vpop.permute.xlu0 %402  ;;  %438 = vst.msk [vmem:[#allocation2 + $0x78] sm:$0xff] %vm422_vm4, %v405_v0 }
 0x162   :  { %437 = vst.msk [vmem:[#allocation2 + $0x70] sm:$0xff] %vm422_vm4, %v403_v1 }
 0x164   :  { %v502_v31 = vpop.permute.xlu1 %501 }
 0x165   :  { %v500_v32 = vpop.permute.xlu0 %499  ;;  %535 = vst.msk [vmem:[#allocation2 + $0x78] sm:$0xff] %vm519_vm5, %v502_v31 }
 0x166   :  { %534 = vst.msk [vmem:[#allocation2 + $0x70] sm:$0xff] %vm519_vm5, %v500_v32 }
 0x168   :  { %v600_v2 = vpop.permute.xlu1 %599 }
 0x169   :  { %v598_v3 = vpop.permute.xlu0 %597  ;;  %633 = vst.msk [vmem:[#allocation2 + $0x78] sm:$0xff] %vm617_vm6, %v600_v2 }
 0x16a   :  { %632 = vst.msk [vmem:[#allocation2 + $0x70] sm:$0xff] %vm617_vm6, %v598_v3 }
 0x16c   :  { %v698_v22 = vpop.permute.xlu1 %697 }
 0x16d   :  { %v696_v4 = vpop.permute.xlu0 %695  ;;  %731 = vst.msk [vmem:[#allocation2 + $0x78] sm:$0xff] %vm715_vm7, %v698_v22 }
 0x16e   :  { %730 = vst.msk [vmem:[#allocation2 + $0x70] sm:$0xff] %vm715_vm7, %v696_v4 }
 0x170   :  { %v795_v5 = vpop.permute.xlu1 %794 }
 0x171   :  { %v793_v6 = vpop.permute.xlu0 %792  ;;  %828 = vst.msk [vmem:[#allocation2 + $0x78] sm:$0xff] %vm812_vm8, %v795_v5 }
 0x172   :  { %827 = vst.msk [vmem:[#allocation2 + $0x70] sm:$0xff] %vm812_vm8, %v793_v6 }
 0x178   :  { %v844_v8 = vld [vmem:[#allocation2 + $0x78] sm:$0xff] }
 0x179   :  { %v843_v7 = vld [vmem:[#allocation2 + $0x70] sm:$0xff] }
 0x17a   :  { %v1199_v9 = vpack.c.bf16 %v844_v8, %v843_v7 }
 0x17c   :  { %1201 = vmatpush3.bf16.xpose.msk.msra.mxu0 %vm1631_vm10, %v1199_v9 }
 0x182   :  { %v850_v11 = vpop.permute.xlu0 %849 }
 0x183   :  { %1168 = vmatmul.mubr.msk.f32.vlgmr.msra.gmra.mrb[0].mxu0 %vm852_vm9, %v845_v10 }
 0x256   :  { %v970_v12 = vpop.f32.mrb[0].mxu0 }
 0x257   :  { %v971_v13 = vadd.f32 %v970_v12, %v850_v11  ;;  %v1169_v14 = vpop.f32.mrb[1].mxu0 }
 0x259   :  { %974 = vst [vmem:[#allocation3] sm:$0xff] %v971_v13 }
 0x25a   :  { %1227 = shalt.err (!%p1224_p4)
}
 0x25b   :  { %s1228_s1 = scalar_lea.hbm %s1943_s3, 128 }
 0x25c   :  { %p1229_p5 = scmp.ne.s32.totalorder %s1943_s3, %s1228_s1  ;;  %p1232_p6 = scmp.lt.u32.totalorder %s1228_s1, %s1943_s3 }
 0x25e   :  { %p1234_p7 = pnand %p1232_p6, %p1229_p5 }
 0x260   :  { %1237 = shalt.err (!%p1234_p7)
}
 0x261   :  { %984 = dma.vmem_to_hbm [thread:$0]  %s982_s19, 128, %s1943_s3, [#allocation4]  }
 0x262   :  { %1238 = dma.done.wait [#allocation4], 128  }
 0x263   :  { %1239 = vsyncadd [#allocation4], 4294967168 }
 0x264   :  { %988 = vsyncpa [#allocation4], 1 }

</bundles_post_ra>
